<compile_context>
chip_gen: v5e
topology: v5e:2x2
jax: 0.10.0
libtpu: 0.0.40
codegen_flags: <defaults>
</compile_context>

<pallas_src>
import functools
from typing import Dict, Sequence, Tuple, Union

import jax
import jax.numpy as jnp
from jax.experimental import pallas as pl
from jax.experimental.pallas import tpu as pltpu

INPUT_TYPES = Union[jnp.ndarray, Sequence[jnp.ndarray], Dict]


def _round_up(x: int, m: int) -> int:
    return ((x + m - 1) // m) * m


def _pick_tile(dim: int, target: int, unit: int) -> int:
    """Largest legal block dim: a multiple of `unit`, or the full extent."""
    if dim <= unit:
        return dim                       # full extent is always legal
    if dim >= target:
        return target                    # target is a multiple of unit
    return dim if dim % unit == 0 else (dim // unit) * unit


def _default_vmem_limit() -> int:
    try:
        cap = pltpu.get_tpu_info().vmem_capacity_bytes
    except Exception:
        cap = 64 * 1024 * 1024
    # ~5/8 of physical: ~40 MiB on v7x (64 MiB VMEM), ~80 MiB on v5e/v6e.
    return min(int(cap * 5 // 8), 96 * 1024 * 1024)


# ----------------------------------------------------------------------------
# Pallas kernel: masked sigmoid-BCE, folded to per-row-block (8,128) partials.
# ----------------------------------------------------------------------------
def _fold_to_vreg(v, tile_rows: int, tile_cols: int):
    """(tile_rows, tile_cols) f32 -> (8, 128) partial sum.

    Stage 1 is a pure-view reshape (row axis split at sublane granularity)
    followed by VPU adds; stage 2 folds 128-lane groups of the small
    (8, tile_cols) slab.
    """
    v = v.reshape(tile_rows // 8, 8, tile_cols).sum(axis=0)     # (8, tile_cols)
    acc = v[:, 0:128]
    for c in range(1, tile_cols // 128):
        acc = acc + v[:, c * 128:(c + 1) * 128]
    return acc


def _masked_bce_kernel(pred_ref, tgt_ref, mask_ref,
                       loss_part_ref, mask_part_ref,
                       *, rows, cols, tile_rows, tile_cols):
    i = pl.program_id(0)   # row-block axis   ("parallel")
    j = pl.program_id(1)   # col-block axis   ("arbitrary" reduction, last)

    @pl.when(j == 0)
    def _init():
        loss_part_ref[...] = jnp.zeros_like(loss_part_ref)
        mask_part_ref[...] = jnp.zeros_like(mask_part_ref)

    # Load native-dtype tiles (bf16 / f32 / int) and cast to f32 in-register.
    x = pred_ref[...].astype(jnp.float32)   # logits          (tile_rows, tile_cols)
    t = tgt_ref[...].astype(jnp.float32)    # binary targets
    m = mask_ref[...].astype(jnp.float32)   # valid-pixel mask

    # Numerically stable sigmoid BCE-with-logits:
    #   max(x, 0) - x*t + log(1 + exp(-|x|))
    bce = jnp.maximum(x, 0.0) - x * t + jnp.log1p(jnp.exp(-jnp.abs(x)))

    # Mask out-of-bounds regions of ragged edge tiles (statically gated per
    # axis).  Selects (not multiplies) so NaN/Inf garbage in the padded block
    # region cannot leak into the sums.
    need_row_mask = (rows % tile_rows) != 0
    need_col_mask = (cols % tile_cols) != 0
    if need_row_mask or need_col_mask:
        valid = None
        if need_row_mask:
            rid = (jax.lax.broadcasted_iota(jnp.int32, (tile_rows, tile_cols), 0)
                   + i * tile_rows)
            valid = rid < rows
        if need_col_mask:
            cid = (jax.lax.broadcasted_iota(jnp.int32, (tile_rows, tile_cols), 1)
                   + j * tile_cols)
            cvalid = cid < cols
            valid = cvalid if valid is None else (valid & cvalid)
        bce = jnp.where(valid, bce, 0.0)
        m = jnp.where(valid, m, 0.0)

    loss_contrib = bce * m
    mask_contrib = m

    if tile_rows % 8 == 0 and tile_cols % 128 == 0:
        # Fast path: accumulate a single (8,128) vreg partial directly into
        # the output block, which stays resident in VMEM across the j sweep.
        loss_part_ref[0] += _fold_to_vreg(loss_contrib, tile_rows, tile_cols)
        mask_part_ref[0] += _fold_to_vreg(mask_contrib, tile_rows, tile_cols)
    else:
        # Fallback for tiny / irregular tiles (rows < 8 or cols < 128): full
        # reduce and deposit the scalar at lane (0, 0) of the partial block.
        onehot = ((jax.lax.broadcasted_iota(jnp.int32, (8, 128), 0) == 0)
                  & (jax.lax.broadcasted_iota(jnp.int32, (8, 128), 1) == 0))
        s_l = jnp.sum(jnp.sum(loss_contrib, axis=1, keepdims=True),
                      axis=0, keepdims=True)               # (1, 1)
        s_m = jnp.sum(jnp.sum(mask_contrib, axis=1, keepdims=True),
                      axis=0, keepdims=True)               # (1, 1)
        loss_part_ref[0] += jnp.where(onehot, s_l, 0.0)
        mask_part_ref[0] += jnp.where(onehot, s_m, 0.0)


def masked_bce_loss(pred_nchw: jnp.ndarray,
                    target_nchw: jnp.ndarray,
                    mask_nchw: jnp.ndarray,
                    *,
                    tile_rows: int = 512,
                    tile_cols: int = 2048) -> jnp.ndarray:
    """Masked mean sigmoid-BCE over a (B, C, H, W) prediction map."""
    assert pred_nchw.shape == target_nchw.shape == mask_nchw.shape
    assert pred_nchw.ndim == 4
    B, C, H, W = pred_nchw.shape

    # View as (B*C*H, W): contiguous, so the reshape is free, and the sublane
    # (row) axis is large -> big tiles and many "parallel" row-blocks.
    rows, cols = B * C * H, W
    pred = pred_nchw.reshape(rows, cols)
    tgt = target_nchw.reshape(rows, cols)
    msk = mask_nchw.reshape(rows, cols)

    # Tile sizes: multiples of (8, 128) (rows rounded to 16 for bf16 packing)
    # or the full extent; ragged edge blocks are masked in-kernel (no pad).
    tr_target = max(8, _round_up(tile_rows, 16))
    tc_target = max(128, _round_up(tile_cols, 128))
    tr = _pick_tile(rows, tr_target, 8)
    tc = _pick_tile(cols, tc_target, 128)
    ni = pl.cdiv(rows, tr)
    nj = pl.cdiv(cols, tc)

    kernel = functools.partial(_masked_bce_kernel,
                               rows=rows, cols=cols,
                               tile_rows=tr, tile_cols=tc)

    in_spec = pl.BlockSpec((tr, tc), lambda i, j: (i, j))
    out_spec = pl.BlockSpec((1, 8, 128), lambda i, j: (i, 0, 0))

    loss_parts, mask_parts = pl.pallas_call(
        kernel,
        out_shape=(jax.ShapeDtypeStruct((ni, 8, 128), jnp.float32),
                   jax.ShapeDtypeStruct((ni, 8, 128), jnp.float32)),
        grid_spec=pltpu.PrefetchScalarGridSpec(
            num_scalar_prefetch=0,
            grid=(ni, nj),
            in_specs=[in_spec, in_spec, in_spec],
            out_specs=[out_spec, out_spec],
        ),
        compiler_params=pltpu.CompilerParams(
            dimension_semantics=("parallel", "arbitrary"),
            vmem_limit_bytes=_default_vmem_limit()),
    )(pred, tgt, msk)

    # Tiny final reduction outside the kernel.
    # TODO(synk): for >2^24 valid pixels consider compensated summation here.
    loss_sum = jnp.sum(loss_parts)
    mask_sum = jnp.sum(mask_parts)
    return loss_sum / jnp.maximum(mask_sum, 1.0)


# ----------------------------------------------------------------------------
# Module mirroring BaseTextDetModuleLoss (no learnable params in __init__).
# ----------------------------------------------------------------------------
class BaseTextDetModuleLoss:
    """JAX/Pallas counterpart of mmocr's BaseTextDetModuleLoss.

    The original class is abstract; this provides the canonical concrete
    behaviour (masked map BCE) so the Pallas hot path can be exercised.
    """

    def __init__(self) -> None:
        # TODO(synk): original base class defines no parameters and leaves
        # forward/get_targets abstract; concrete subclass semantics vary.
        pass

    def get_targets(self, data_samples: Sequence[Dict]) -> Tuple[jnp.ndarray,
                                                                 jnp.ndarray]:
        """Stack per-sample ground-truth maps / masks into batch tensors.

        Targets/masks should be stored upstream in bf16 (or int8) — the
        kernel casts to f32 after the HBM load, so narrow storage directly
        cuts HBM traffic of this memory-bound loss.
        """
        gt_maps = jnp.stack([ds["gt_map"] for ds in data_samples], axis=0)
        gt_masks = jnp.stack([ds["gt_mask"] for ds in data_samples], axis=0)
        return gt_maps, gt_masks

    def forward(self,
                inputs: INPUT_TYPES,
                data_samples: Sequence[Dict] = None) -> Dict[str, jnp.ndarray]:
        gt_maps, gt_masks = self.get_targets(data_samples)
        loss = masked_bce_loss(inputs, gt_maps, gt_masks)
        return {"loss_text": loss}

    __call__ = forward


# ----------------------------------------------------------------------------
# Demo / correctness checks
# ----------------------------------------------------------------------------
if __name__ == "__main__":
    def reference(pred, tgt, msk):
        x = pred.astype(jnp.float32)
        t = tgt.astype(jnp.float32)
        m = msk.astype(jnp.float32)
        bce = jnp.maximum(x, 0.0) - x * t + jnp.log1p(jnp.exp(-jnp.abs(x)))
        return jnp.sum(bce * m) / jnp.maximum(jnp.sum(m), 1.0)

    key = jax.random.PRNGKey(0)

    # Case 1: module-level path (small demo shape -> fallback reduction path).
    B, C, H, W = 2, 4, 16, 16
    k1, k2, k3, key = jax.random.split(key, 4)
    preds = jax.random.normal(k1, (B, C, H, W)).astype(jnp.bfloat16)
    gts = (jax.random.uniform(k2, (B, C, H, W)) > 0.5).astype(jnp.bfloat16)
    msks = (jax.random.uniform(k3, (B, C, H, W)) > 0.1).astype(jnp.bfloat16)
    data_samples = [{"gt_map": gts[b], "gt_mask": msks[b]} for b in range(B)]
    module = BaseTextDetModuleLoss()
    out = module(preds, data_samples)
    loss1 = jax.block_until_ready(out["loss_text"])
    ref1 = reference(preds, gts, msks)
    assert jnp.allclose(loss1, ref1, rtol=2e-3, atol=2e-3), (loss1, ref1)

    # Case 2: fast (8,128)-partial path with ragged edge blocks on both axes.
    shp = (2, 2, 9, 130)
    k1, k2, k3, key = jax.random.split(key, 4)
    p2 = jax.random.normal(k1, shp).astype(jnp.bfloat16)
    t2 = (jax.random.uniform(k2, shp) > 0.5).astype(jnp.bfloat16)
    m2 = (jax.random.uniform(k3, shp) > 0.1).astype(jnp.float32)
    loss2 = jax.block_until_ready(
        masked_bce_loss(p2, t2, m2, tile_rows=32, tile_cols=128))
    ref2 = reference(p2, t2, m2)
    assert jnp.allclose(loss2, ref2, rtol=2e-3, atol=2e-3), (loss2, ref2)

    # Case 3: fast path, exact tiling, default tile caps.
    shp = (2, 4, 8, 256)
    k1, k2, k3, key = jax.random.split(key, 4)
    p3 = jax.random.normal(k1, shp).astype(jnp.bfloat16)
    t3 = (jax.random.uniform(k2, shp) > 0.5).astype(jnp.bfloat16)
    m3 = (jax.random.uniform(k3, shp) > 0.1).astype(jnp.bfloat16)
    loss3 = jax.block_until_ready(masked_bce_loss(p3, t3, m3))
    ref3 = reference(p3, t3, m3)
    assert jnp.allclose(loss3, ref3, rtol=2e-3, atol=2e-3), (loss3, ref3)

    print("KERNEL_OK")
</pallas_src>

<mosaic_0001>
module attributes {stable_mosaic.version = 11 : i64} {
  func.func @_masked_bce_kernel(%arg0: i32, %arg1: i32, %arg2: memref<128x16xbf16, #tpu.memory_space<vmem>>, %arg3: memref<128x16xbf16, #tpu.memory_space<vmem>>, %arg4: memref<128x16xbf16, #tpu.memory_space<vmem>>, %arg5: memref<1x8x128xf32, #tpu.memory_space<vmem>>, %arg6: memref<1x8x128xf32, #tpu.memory_space<vmem>>) attributes {dimension_semantics = [#tpu.dimension_semantics<parallel>, #tpu.dimension_semantics<arbitrary>], iteration_bounds = array<i64: 1, 1>, scalar_prefetch = 0 : i64, scratch_operands = 0 : i64, tpu.core_type = #tpu.core_type<tc>, window_params = [{transform_indices = @transform_0, window_bounds = array<i64: 128, 16>}, {transform_indices = @transform_1, window_bounds = array<i64: 128, 16>}, {transform_indices = @transform_2, window_bounds = array<i64: 128, 16>}, {transform_indices = @transform_3, window_bounds = array<i64: 1, 8, 128>}, {transform_indices = @transform_4, window_bounds = array<i64: 1, 8, 128>}]} {
    %c0_i32 = arith.constant 0 : i32
    %0 = arith.cmpi eq, %arg1, %c0_i32 : i32
    %1 = arith.extui %0 : i1 to i32
    %c0_i32_0 = arith.constant 0 : i32
    %2 = arith.cmpi ne, %1, %c0_i32_0 : i32
    scf.if %2 {
      %cst_27 = arith.constant 0.000000e+00 : f32
      %55 = vector.broadcast %cst_27 : f32 to vector<1x8x128xf32>
      %c0_28 = arith.constant 0 : index
      %c0_29 = arith.constant 0 : index
      %c0_30 = arith.constant 0 : index
      %56 = vector.load %arg5[%c0_28, %c0_29, %c0_30] : memref<1x8x128xf32, #tpu.memory_space<vmem>>, vector<1x8x128xf32>
      tpu.vector_store %arg5[%c0_28, %c0_29, %c0_30], %55 {strides = array<i32>} : memref<1x8x128xf32, #tpu.memory_space<vmem>>, vector<1x8x128xf32>,
      %cst_31 = arith.constant 0.000000e+00 : f32
      %57 = vector.broadcast %cst_31 : f32 to vector<1x8x128xf32>
      %c0_32 = arith.constant 0 : index
      %c0_33 = arith.constant 0 : index
      %c0_34 = arith.constant 0 : index
      %58 = vector.load %arg6[%c0_32, %c0_33, %c0_34] : memref<1x8x128xf32, #tpu.memory_space<vmem>>, vector<1x8x128xf32>
      tpu.vector_store %arg6[%c0_32, %c0_33, %c0_34], %57 {strides = array<i32>} : memref<1x8x128xf32, #tpu.memory_space<vmem>>, vector<1x8x128xf32>,
    } else {
    }
    %c0 = arith.constant 0 : index
    %c0_1 = arith.constant 0 : index
    %3 = vector.load %arg2[%c0, %c0_1] : memref<128x16xbf16, #tpu.memory_space<vmem>>, vector<128x16xbf16>
    %4 = arith.extf %3 : vector<128x16xbf16> to vector<128x16xf32>
    %c0_2 = arith.constant 0 : index
    %c0_3 = arith.constant 0 : index
    %5 = vector.load %arg3[%c0_2, %c0_3] : memref<128x16xbf16, #tpu.memory_space<vmem>>, vector<128x16xbf16>
    %6 = arith.extf %5 : vector<128x16xbf16> to vector<128x16xf32>
    %c0_4 = arith.constant 0 : index
    %c0_5 = arith.constant 0 : index
    %7 = vector.load %arg4[%c0_4, %c0_5] : memref<128x16xbf16, #tpu.memory_space<vmem>>, vector<128x16xbf16>
    %8 = arith.extf %7 : vector<128x16xbf16> to vector<128x16xf32>
    %cst = arith.constant 0.000000e+00 : f32
    %9 = vector.broadcast %cst : f32 to vector<128x16xf32>
    %10 = arith.maximumf %4, %9 : vector<128x16xf32>
    %11 = arith.mulf %4, %6 : vector<128x16xf32>
    %12 = arith.subf %10, %11 : vector<128x16xf32>
    %13 = math.absf %4 : vector<128x16xf32>
    %cst_6 = arith.constant 0.000000e+00 : f32
    %14 = vector.broadcast %cst_6 : f32 to vector<128x16xf32>
    %15 = arith.subf %14, %13 : vector<128x16xf32>
    %16 = math.exp %15 : vector<128x16xf32>
    %17 = math.log1p %16 : vector<128x16xf32>
    %18 = arith.addf %12, %17 : vector<128x16xf32>
    %19 = arith.mulf %18, %8 : vector<128x16xf32>
    %20 = tpu.iota {dimensions = array<i32: 0>} : vector<8x128xi32>
    %c0_i32_7 = arith.constant 0 : i32
    %21 = vector.broadcast %c0_i32_7 : i32 to vector<8x128xi32>
    %22 = arith.cmpi eq, %20, %21 : vector<8x128xi32>
    %23 = tpu.iota {dimensions = array<i32: 1>} : vector<8x128xi32>
    %c0_i32_8 = arith.constant 0 : i32
    %24 = vector.broadcast %c0_i32_8 : i32 to vector<8x128xi32>
    %25 = arith.cmpi eq, %23, %24 : vector<8x128xi32>
    %26 = arith.andi %22, %25 : vector<8x128xi1>
    %cst_9 = arith.constant dense<0.000000e+00> : vector<128xf32>
    %27 = vector.multi_reduction <add>, %19, %cst_9 [1] : vector<128x16xf32> to vector<128xf32>
    %28 = vector.shape_cast %27 : vector<128xf32> to vector<128x1xf32>
    %cst_10 = arith.constant dense<0.000000e+00> : vector<1xf32>
    %29 = vector.multi_reduction <add>, %28, %cst_10 [0] : vector<128x1xf32> to vector<1xf32>
    %30 = vector.shape_cast %29 : vector<1xf32> to vector<1x1xf32>
    %cst_11 = arith.constant dense<0.000000e+00> : vector<128xf32>
    %31 = vector.multi_reduction <add>, %8, %cst_11 [1] : vector<128x16xf32> to vector<128xf32>
    %32 = vector.shape_cast %31 : vector<128xf32> to vector<128x1xf32>
    %cst_12 = arith.constant dense<0.000000e+00> : vector<1xf32>
    %33 = vector.multi_reduction <add>, %32, %cst_12 [0] : vector<128x1xf32> to vector<1xf32>
    %34 = vector.shape_cast %33 : vector<1xf32> to vector<1x1xf32>
    %c0_13 = arith.constant 0 : index
    %c0_14 = arith.constant 0 : index
    %c0_15 = arith.constant 0 : index
    %35 = vector.load %arg5[%c0_13, %c0_14, %c0_15] : memref<1x8x128xf32, #tpu.memory_space<vmem>>, vector<1x8x128xf32>
    %36 = vector.shape_cast %35 : vector<1x8x128xf32> to vector<8x128xf32>
    %cst_16 = arith.constant 0.000000e+00 : f32
    %37 = vector.shape_cast %30 : vector<1x1xf32> to vector<1x1xf32>
    %38 = vector.broadcast %37 : vector<1x1xf32> to vector<8x128xf32>
    %39 = vector.broadcast %cst_16 : f32 to vector<8x128xf32>
    %40 = arith.select %26, %38, %39 : vector<8x128xi1>, vector<8x128xf32>
    %41 = arith.addf %36, %40 : vector<8x128xf32>
    %c0_17 = arith.constant 0 : index
    %c0_18 = arith.constant 0 : index
    %c0_19 = arith.constant 0 : index
    %42 = vector.load %arg5[%c0_17, %c0_18, %c0_19] : memref<1x8x128xf32, #tpu.memory_space<vmem>>, vector<1x8x128xf32>
    %43 = vector.shape_cast %42 : vector<1x8x128xf32> to vector<8x128xf32>
    %44 = vector.shape_cast %41 : vector<8x128xf32> to vector<1x8x128xf32>
    tpu.vector_store %arg5[%c0_17, %c0_18, %c0_19], %44 {strides = array<i32>} : memref<1x8x128xf32, #tpu.memory_space<vmem>>, vector<1x8x128xf32>,
    %c0_20 = arith.constant 0 : index
    %c0_21 = arith.constant 0 : index
    %c0_22 = arith.constant 0 : index
    %45 = vector.load %arg6[%c0_20, %c0_21, %c0_22] : memref<1x8x128xf32, #tpu.memory_space<vmem>>, vector<1x8x128xf32>
    %46 = vector.shape_cast %45 : vector<1x8x128xf32> to vector<8x128xf32>
    %cst_23 = arith.constant 0.000000e+00 : f32
    %47 = vector.shape_cast %34 : vector<1x1xf32> to vector<1x1xf32>
    %48 = vector.broadcast %47 : vector<1x1xf32> to vector<8x128xf32>
    %49 = vector.broadcast %cst_23 : f32 to vector<8x128xf32>
    %50 = arith.select %26, %48, %49 : vector<8x128xi1>, vector<8x128xf32>
    %51 = arith.addf %46, %50 : vector<8x128xf32>
    %c0_24 = arith.constant 0 : index
    %c0_25 = arith.constant 0 : index
    %c0_26 = arith.constant 0 : index
    %52 = vector.load %arg6[%c0_24, %c0_25, %c0_26] : memref<1x8x128xf32, #tpu.memory_space<vmem>>, vector<1x8x128xf32>
    %53 = vector.shape_cast %52 : vector<1x8x128xf32> to vector<8x128xf32>
    %54 = vector.shape_cast %51 : vector<8x128xf32> to vector<1x8x128xf32>
    tpu.vector_store %arg6[%c0_24, %c0_25, %c0_26], %54 {strides = array<i32>} : memref<1x8x128xf32, #tpu.memory_space<vmem>>, vector<1x8x128xf32>,
    return
  }
  func.func @transform_0(%arg0: i32, %arg1: i32) -> (i32, i32) {
    %c0_i32 = arith.constant 0 : i32
    return %arg0, %arg1 : i32, i32
  }
  func.func @transform_1(%arg0: i32, %arg1: i32) -> (i32, i32) {
    %c0_i32 = arith.constant 0 : i32
    return %arg0, %arg1 : i32, i32
  }
  func.func @transform_2(%arg0: i32, %arg1: i32) -> (i32, i32) {
    %c0_i32 = arith.constant 0 : i32
    return %arg0, %arg1 : i32, i32
  }
  func.func @transform_3(%arg0: i32, %arg1: i32) -> (i32, i32, i32) {
    %c0_i32 = arith.constant 0 : i32
    %c0_i32_0 = arith.constant 0 : i32
    %c0_i32_1 = arith.constant 0 : i32
    return %arg0, %c0_i32, %c0_i32_0 : i32, i32, i32
  }
  func.func @transform_4(%arg0: i32, %arg1: i32) -> (i32, i32, i32) {
    %c0_i32 = arith.constant 0 : i32
    %c0_i32_0 = arith.constant 0 : i32
    %c0_i32_1 = arith.constant 0 : i32
    return %arg0, %c0_i32, %c0_i32_0 : i32, i32, i32
  }
}

</mosaic_0001>

<bundles_post_ra>
// kernel: tpu_custom_call.1
= control target key start
LH: loop header
LB: loop body
LE: loop exit
PB: predicated region body
PF: predicated region fallthrough
CT: control target
= control target key end

     0   :  { %10 = vsyncpa [#allocation3], 0  ;;  %vm415_vm0 = vcmask 130048   ;;  %s1198_s0 = inlined_call_operand.vmem [shape: bf16[128,16], index: 0, kind: input, shape index: {}]   ;;  %s1199_s1 = inlined_call_operand.vmem [shape: bf16[128,16], index: 1, kind: input, shape index: {}]   ;;  %s1200_s2 = inlined_call_operand.vmem [shape: bf16[128,16], index: 2, kind: input, shape index: {}]   ;;  %s1201_s3 = inlined_call_operand.hbm [shape: f32[1,8,128], index: 3, kind: output, shape index: {0}]   ;;  %s1202_s4 = inlined_call_operand.hbm [shape: f32[1,8,128], index: 4, kind: output, shape index: {1}]  }
   0x1   :  { %v860_v0 = vld [vmem:[%s1200_s2] sm:$0xff]   ;;  %v865_v1 = vld [vmem:[%s1200_s2 + $0x8] sm:$0xff]   ;;  %v873_v5 = vld [vmem:[%s1200_s2 + $0x10] sm:$0xff]  }
   0x2   :  { %v660_v2 = vunpack.c.l.bf16 %v860_v0  ;;  %v664_v3 = vunpack.c.l.bf16 %v865_v1  ;;  %v665_v4 = vunpack.c.h.bf16 %v865_v1  ;;  %v878_v6 = vld [vmem:[%s1200_s2 + $0x18] sm:$0xff]   ;;  %v690_v7 = vld [vmem:[%s1198_s0 + $0x8] sm:$0xff]   ;;  %v595_v9 = vld [vmem:[%s1198_s0] sm:$0xff]   ;;  %v661_v12 = vunpack.c.h.bf16 %v860_v0 }
   0x3   :  { %v883_v8 = vunpack.c.l.bf16 %v690_v7  ;;  %v697_v14 = vld [vmem:[%s1199_s1 + $0x8] sm:$0xff]   ;;  %v668_v15 = vunpack.c.l.bf16 %v873_v5  ;;  %v672_v16 = vunpack.c.l.bf16 %v878_v6 }
   0x4   :  { %v485_v10 = vsel %vm415_vm0, %v660_v2, 0.0  ;;  %v491_v11 = vsel %vm415_vm0, %v664_v3, 0.0  ;;  %v494_v13 = vsel %vm415_vm0, %v665_v4, 0.0 }
   0x5   :  { %486 = vadd.xlane.f32.xlu2 %v485_v10  ;;  %492 = vadd.xlane.f32.xlu0 %v491_v11 }
   0x6   :  { %11 = vsyncpa [#allocation5], 0  ;;  %495 = vadd.xlane.f32.xlu1 %v494_v13  ;;  %v170_v17 = vand.u32 2147483647, %v883_v8  ;;  %v596_v18 = vunpack.c.l.bf16 %v595_v9  ;;  %v627_v19 = vld [vmem:[%s1199_s1] sm:$0xff]   ;;  %v632_v20 = vunpack.c.l.bf16 %v697_v14  ;;  %v601_v21 = vunpack.c.h.bf16 %v690_v7  ;;  %v691_v31 = vld [vmem:[%s1198_s0 + $0x10] sm:$0xff]  }
   0x7   :  { %v597_v22 = vunpack.c.h.bf16 %v595_v9  ;;  %v488_v23 = vsel %vm415_vm0, %v661_v12, 0.0  ;;  %v669_v24 = vunpack.c.h.bf16 %v873_v5  ;;  %v497_v27 = vsel %vm415_vm0, %v668_v15, 0.0  ;;  %v698_v43 = vld [vmem:[%s1199_s1 + $0x10] sm:$0xff]   ;;  %v930_v48 = vld [vmem:[%s1198_s0 + $0x18] sm:$0xff]   ;;  %s569_s12 = sshll.u32 %s1201_s3, 4  ;;  %s831_s13 = smov [#allocation4]   ;;  %s570_s12 = int_to_ptr.hbm [resolvable:$true] %s569_s12 }
   0x8   :  { %v186_v25 = vsub.f32 0.0, %v170_v17  ;;  %v168_v26 = vand.u32 2147483647, %v596_v18  ;;  %v503_v28 = vsel %vm415_vm0, %v672_v16, 0.0  ;;  %v628_v29 = vunpack.c.l.bf16 %v627_v19  ;;  %s578_s14 = sshll.u32 %s831_s13, 4  ;;  %s580_s17 = sshll.u32 %s1202_s4, 4  ;;  %s579_s14 = int_to_ptr.vmem [resolvable:$true] %s578_s14  ;;  %s581_s17 = int_to_ptr.hbm [resolvable:$true] %s580_s17 }
   0x9   :  { %v171_v30 = vand.u32 2147483647, %v601_v21  ;;  %v122_v32 = vmax.f32 %v883_v8, 0.0  ;;  %v633_v35 = vunpack.c.h.bf16 %v697_v14  ;;  %v138_v36 = vmul.f32 %v632_v20, %v883_v8 }
   0xa   :  { %v204_v33 = vmul.f32 1.442695, %v186_v25  ;;  %v184_v34 = vsub.f32 0.0, %v168_v26  ;;  %v120_v37 = vmax.f32 %v596_v18, 0.0  ;;  %v169_v39 = vand.u32 2147483647, %v597_v22 }
   0xb   :  { %v187_v38 = vsub.f32 0.0, %v171_v30  ;;  %v629_v41 = vunpack.c.h.bf16 %v627_v19  ;;  %v604_v42 = vunpack.c.l.bf16 %v691_v31  ;;  %v136_v44 = vmul.f32 %v628_v29, %v596_v18 }
   0xc   :  { %714 = vpow2.f32 %v204_v33  ;;  %v200_v40 = vmul.f32 1.442695, %v184_v34  ;;  %v185_v46 = vsub.f32 0.0, %v169_v39  ;;  %v925_v47 = vunpack.c.h.bf16 %v691_v31 }
   0xd   :  { %489 = vadd.xlane.f32.xlu2 %v488_v23  ;;  %498 = vadd.xlane.f32.xlu0 %v497_v27  ;;  %v206_v45 = vmul.f32 1.442695, %v187_v38  ;;  %v123_v49 = vmax.f32 %v601_v21, 0.0  ;;  %v139_v50 = vmul.f32 %v633_v35, %v601_v21  ;;  %v172_v51 = vand.u32 2147483647, %v604_v42 }
   0xe   :  { %504 = vadd.xlane.f32.xlu1 %v503_v28  ;;  %716 = vpow2.f32 %v200_v40  ;;  %v121_v52 = vmax.f32 %v597_v22, 0.0  ;;  %v202_v53 = vmul.f32 1.442695, %v185_v46  ;;  %v636_v54 = vunpack.c.l.bf16 %v698_v43 }
   0xf   :  { %718 = vpow2.f32 %v206_v45  ;;  %v137_v55 = vmul.f32 %v629_v41, %v597_v22  ;;  %v188_v56 = vsub.f32 0.0, %v172_v51  ;;  %v173_v57 = vand.u32 2147483647, %v925_v47 }
  0x10   :  { %v934_v58 = vunpack.c.l.bf16 %v930_v48  ;;  %v500_v59 = vsel %vm415_vm0, %v669_v24, 0.0  ;;  %v939_v60 = vsub.f32 %v122_v32, %v138_v36  ;;  %v941_v61 = vsub.f32 %v120_v37, %v136_v44 }
  0x11   :  { %720 = vpow2.f32 %v202_v53  ;;  %v124_v63 = vmax.f32 %v604_v42, 0.0  ;;  %v208_v7 = vmul.f32 1.442695, %v188_v56  ;;  %v189_v8 = vsub.f32 0.0, %v173_v57 }
  0x12   :  { %v715_v62 = vpop.eup %714  ;;  %v174_v9 = vand.u32 2147483647, %v934_v58  ;;  %v140_v13 = vmul.f32 %v636_v54, %v604_v42  ;;  %v637_v14 = vunpack.c.h.bf16 %v698_v43  ;;  %v944_v19 = vsub.f32 %v123_v49, %v139_v50  ;;  %v961_v54 = vld [vmem:[%s1199_s1 + $0x18] sm:$0xff]  }
  0x13   :  { %v250_v10 = vadd.f32 1.0, %v715_v62  ;;  %v253_v11 = vmul.f32 -0.5, %v715_v62  ;;  %v256_v18 = vand.u32 2147483647, %v715_v62  ;;  %v946_v20 = vsub.f32 %v121_v52, %v137_v55 }
  0x14   :  { %v717_v17 = vpop.eup %716  ;;  %722 = vpow2.f32 %v208_v7  ;;  %v210_v23 = vmul.f32 1.442695, %v189_v8  ;;  %v190_v25 = vsub.f32 0.0, %v174_v9  ;;  %v948_v31 = vsub.f32 %v124_v63, %v140_v13 }
  0x15   :  { %v719_v21 = vpop.eup %718  ;;  %501 = vadd.xlane.f32.xlu2 %v500_v59  ;;  %724 = vlog2.f32 %v250_v10  ;;  %v232_v22 = vadd.f32 1.0, %v717_v17  ;;  %v254_v26 = vadd.f32 1.0, %v253_v11  ;;  %v235_v27 = vmul.f32 -0.5, %v717_v17 }
  0x16   :  { %v259_v28 = vadd.f32 1.0, %v719_v21  ;;  %v262_v29 = vmul.f32 -0.5, %v719_v21  ;;  %v125_v32 = vmax.f32 %v925_v47, 0.0  ;;  %v952_v33 = vmul.f32 %v637_v14, %v925_v47 }
  0x17   :  { %v721_v30 = vpop.eup %720  ;;  %726 = vlog2.f32 %v232_v22  ;;  %vm954_vm1 = vcmp.lt.f32.partialorder %v256_v18, 0.0004427343  ;;  %v236_v35 = vadd.f32 1.0, %v235_v27  ;;  %v238_v36 = vand.u32 2147483647, %v717_v17 }
  0x18   :  { %728 = vlog2.f32 %v259_v28  ;;  %v263_v37 = vadd.f32 1.0, %v262_v29  ;;  %v265_v38 = vand.u32 2147483647, %v719_v21  ;;  %v241_v39 = vadd.f32 1.0, %v721_v30 }
  0x19   :  { %v244_v40 = vmul.f32 -0.5, %v721_v30  ;;  %v255_v42 = vmul.f32 %v715_v62, %v254_v26  ;;  %v247_v43 = vand.u32 2147483647, %v721_v30  ;;  %730 = vpow2.f32 %v210_v23 }
  0x1a   :  { %v723_v41 = vpop.eup %722  ;;  %v212_v44 = vmul.f32 1.442695, %v190_v25  ;;  %v237_v46 = vmul.f32 %v717_v17, %v236_v35  ;;  %732 = vlog2.f32 %v241_v39  ;;  %vm963_vm2 = vcmp.lt.f32.partialorder %v238_v36, 0.0004427343 }
  0x1b   :  { %v725_v45 = vpop.eup %724  ;;  %v245_v49 = vadd.f32 1.0, %v244_v40  ;;  %v268_v50 = vadd.f32 1.0, %v723_v41  ;;  %v271_v52 = vmul.f32 -0.5, %v723_v41  ;;  %v274_v53 = vand.u32 2147483647, %v723_v41 }
  0x1c   :  { %v252_v51 = vmul.f32 0.6931472, %v725_v45  ;;  %734 = vpow2.f32 %v212_v44  ;;  %v264_v57 = vmul.f32 %v719_v21, %v263_v37  ;;  %vm967_vm3 = vcmp.lt.f32.partialorder %v265_v38, 0.0004427343 }
  0x1d   :  { %v727_v55 = vpop.eup %726  ;;  %736 = vlog2.f32 %v268_v50  ;;  %v272_v8 = vadd.f32 1.0, %v271_v52  ;;  %v974_v9 = vunpack.c.h.bf16 %v930_v48  ;;  %vm977_vm4 = vcmp.lt.f32.partialorder %v247_v43, 0.0004427343 }
  0x1e   :  { %v729_v62 = vpop.eup %728  ;;  %v258_v63 = vsel %vm954_vm1, %v255_v42, %v252_v51  ;;  %v234_v7 = vmul.f32 0.6931472, %v727_v55  ;;  %v640_v14 = vunpack.c.l.bf16 %v961_v54  ;;  %v246_v21 = vmul.f32 %v721_v30, %v245_v49 }
  0x1f   :  { %v378_v10 = vadd.f32 %v258_v63, %v939_v60  ;;  %v261_v11 = vmul.f32 0.6931472, %v729_v62  ;;  %v731_v17 = vpop.eup %730  ;;  %v273_v22 = vmul.f32 %v723_v41, %v272_v8  ;;  %vm984_vm5 = vcmp.lt.f32.partialorder %v274_v53, 0.0004427343 }
  0x20   :  { %v240_v18 = vsel %vm963_vm2, %v237_v46, %v234_v7  ;;  %v733_v48 = vpop.eup %732  ;;  %v277_v27 = vadd.f32 1.0, %v731_v17  ;;  %v280_v30 = vmul.f32 -0.5, %v731_v17  ;;  %v175_v35 = vand.u32 2147483647, %v974_v9 }
  0x21   :  { %v394_v60 = vmul.f32 %v664_v3, %v378_v10  ;;  %v376_v25 = vadd.f32 %v240_v18, %v941_v61  ;;  %v267_v26 = vsel %vm967_vm3, %v264_v57, %v261_v11  ;;  %v243_v34 = vmul.f32 0.6931472, %v733_v48  ;;  %v694_v11 = vld [vmem:[%s1198_s0 + $0x28] sm:$0xff]  }
  0x22   :  { %v735_v28 = vpop.eup %734  ;;  %v379_v29 = vadd.f32 %v267_v26, %v944_v19  ;;  %738 = vlog2.f32 %v277_v27  ;;  %v281_v40 = vadd.f32 1.0, %v280_v30  ;;  %v283_v41 = vand.u32 2147483647, %v731_v17  ;;  %v1047_v26 = vld [vmem:[%s1200_s2 + $0x20] sm:$0xff]  }
  0x23   :  { %v737_v36 = vpop.eup %736  ;;  %v422_v37 = vsel %vm415_vm0, %v394_v60, 0.0  ;;  %v392_v38 = vmul.f32 %v660_v2, %v376_v25  ;;  %v286_v3 = vadd.f32 1.0, %v735_v28  ;;  %v249_v61 = vsel %vm977_vm4, %v246_v21, %v243_v34  ;;  %v693_v2 = vld [vmem:[%s1198_s0 + $0x20] sm:$0xff]  }
  0x24   :  { %423 = vadd.xlane.f32.xlu1 %v422_v37  ;;  %v270_v39 = vmul.f32 0.6931472, %v737_v36  ;;  %v395_v42 = vmul.f32 %v665_v4, %v379_v29  ;;  %v377_v43 = vadd.f32 %v249_v61, %v946_v20  ;;  %v126_v45 = vmax.f32 %v934_v58, 0.0 }
  0x25   :  { %v416_v19 = vsel %vm415_vm0, %v392_v38, 0.0  ;;  %740 = vlog2.f32 %v286_v3  ;;  %v142_v46 = vmul.f32 %v640_v14, %v934_v58  ;;  %v289_v49 = vmul.f32 -0.5, %v735_v28 }
  0x26   :  { %417 = vadd.xlane.f32.xlu0 %v416_v19  ;;  %v276_v44 = vsel %vm984_vm5, %v273_v22, %v270_v39  ;;  %v393_v1 = vmul.f32 %v661_v12, %v377_v43  ;;  %v292_v20 = vand.u32 2147483647, %v735_v28  ;;  %v282_v50 = vmul.f32 %v731_v17, %v281_v40  ;;  %v1061_v40 = vld [vmem:[%s1199_s1 + $0x28] sm:$0xff]  }
  0x27   :  { %v380_v4 = vadd.f32 %v276_v44, %v948_v31  ;;  %v290_v51 = vadd.f32 1.0, %v289_v49  ;;  %v191_v52 = vsub.f32 0.0, %v175_v35  ;;  %v1014_v53 = vunpack.c.l.bf16 %v693_v2 }
  0x28   :  { %v739_v55 = vpop.eup %738  ;;  %v425_v56 = vsel %vm415_vm0, %v395_v42, 0.0  ;;  %v157_v58 = vsub.f32 %v125_v32, %v952_v33  ;;  %vm284_vm6 = vcmp.lt.f32.partialorder %v283_v41, 0.0004427343  ;;  %v158_v12 = vsub.f32 %v126_v45, %v142_v46 }
  0x29   :  { %v396_v57 = vmul.f32 %v668_v15, %v380_v4  ;;  %v279_v0 = vmul.f32 0.6931472, %v739_v55  ;;  %v291_v31 = vmul.f32 %v735_v28, %v290_v51  ;;  %v214_v59 = vmul.f32 1.442695, %v191_v52 }
  0x2a   :  { %v419_v63 = vsel %vm415_vm0, %v393_v1, 0.0  ;;  %vm293_vm7 = vcmp.lt.f32.partialorder %v292_v20, 0.0004427343  ;;  %v176_v8 = vand.u32 2147483647, %v1014_v53  ;;  %v641_v32 = vunpack.c.h.bf16 %v961_v54  ;;  %v700_v54 = vld [vmem:[%s1199_s1 + $0x20] sm:$0xff]  }
  0x2b   :  { %v741_v62 = vpop.eup %740  ;;  %v428_v7 = vsel %vm415_vm0, %v396_v57, 0.0  ;;  %v285_v15 = vsel %vm284_vm6, %v282_v50, %v279_v0  ;;  %742 = vpow2.f32 %v214_v59  ;;  %v1029_v14 = vunpack.c.h.bf16 %v693_v2 }
  0x2c   :  { %426 = vadd.xlane.f32.xlu1 %v425_v56  ;;  %429 = vadd.xlane.f32.xlu2 %v428_v7  ;;  %v288_v10 = vmul.f32 0.6931472, %v741_v62  ;;  %v381_v47 = vadd.f32 %v285_v15, %v157_v58  ;;  %v192_v33 = vsub.f32 0.0, %v176_v8  ;;  %v127_v22 = vmax.f32 %v974_v9, 0.0 }
  0x2d   :  { %v177_v23 = vand.u32 2147483647, %v1029_v14  ;;  %v1038_v48 = vunpack.c.l.bf16 %v694_v11  ;;  %v143_v5 = vmul.f32 %v641_v32, %v974_v9  ;;  %v644_v30 = vunpack.c.l.bf16 %v700_v54  ;;  %v695_v9 = vld [vmem:[%s1198_s0 + $0x30] sm:$0xff]  }
  0x2e   :  { %420 = vadd.xlane.f32.xlu0 %v419_v63  ;;  %v294_v13 = vsel %vm293_vm7, %v291_v31, %v288_v10  ;;  %v397_v17 = vmul.f32 %v669_v24, %v381_v47  ;;  %v216_v21 = vmul.f32 1.442695, %v192_v33  ;;  %v673_v37 = vunpack.c.h.bf16 %v878_v6 }
  0x2f   :  { %v382_v18 = vadd.f32 %v294_v13, %v158_v12  ;;  %v193_v27 = vsub.f32 0.0, %v177_v23  ;;  %v178_v36 = vand.u32 2147483647, %v1038_v48  ;;  %v159_v38 = vsub.f32 %v127_v22, %v143_v5  ;;  %v1096_v5 = vld [vmem:[%s1199_s1 + $0x30] sm:$0xff]  }
  0x30   :  { %v431_v60 = vsel %vm415_vm0, %v397_v17, 0.0  ;;  %744 = vpow2.f32 %v216_v21  ;;  %v676_v3 = vunpack.c.l.bf16 %v1047_v26  ;;  %v128_v42 = vmax.f32 %v1014_v53, 0.0 }
  0x31   :  { %v398_v25 = vmul.f32 %v672_v16, %v382_v18  ;;  %v743_v24 = vpop.eup %742  ;;  %v218_v35 = vmul.f32 1.442695, %v193_v27  ;;  %v1051_v16 = vunpack.c.h.bf16 %v694_v11  ;;  %v194_v41 = vsub.f32 0.0, %v178_v36 }
  0x32   :  { %v295_v29 = vadd.f32 1.0, %v743_v24  ;;  %v298_v34 = vmul.f32 -0.5, %v743_v24  ;;  %v301_v39 = vand.u32 2147483647, %v743_v24  ;;  %v144_v43 = vmul.f32 %v644_v30, %v1014_v53 }
  0x33   :  { %v434_v28 = vsel %vm415_vm0, %v398_v25, 0.0  ;;  %v179_v6 = vand.u32 2147483647, %v1051_v16  ;;  %v1066_v2 = vunpack.c.l.bf16 %v695_v9  ;;  %v645_v46 = vunpack.c.h.bf16 %v700_v54 }
  0x34   :  { %432 = vadd.xlane.f32.xlu1 %v431_v60  ;;  %746 = vlog2.f32 %v295_v29  ;;  %v299_v61 = vadd.f32 1.0, %v298_v34  ;;  %v220_v49 = vmul.f32 1.442695, %v194_v41  ;;  %v506_v1 = vsel %vm415_vm0, %v673_v37, 0.0 }
  0x35   :  { %748 = vpow2.f32 %v218_v35  ;;  %v1072_v4 = vsel %vm415_vm0, %v676_v3, 0.0  ;;  %v648_v20 = vunpack.c.l.bf16 %v1061_v40  ;;  %v195_v50 = vsub.f32 0.0, %v179_v6 }
  0x36   :  { %435 = vadd.xlane.f32.xlu0 %v434_v28  ;;  %v745_v19 = vpop.eup %744  ;;  %v300_v51 = vmul.f32 %v743_v24, %v299_v61  ;;  %vm1075_vm8 = vcmp.lt.f32.partialorder %v301_v39, 0.0004427343  ;;  %v129_v53 = vmax.f32 %v1029_v14, 0.0  ;;  %v180_v58 = vand.u32 2147483647, %v1066_v2 }
  0x37   :  { %v304_v44 = vadd.f32 1.0, %v745_v19  ;;  %v307_v45 = vmul.f32 -0.5, %v745_v19  ;;  %v222_v57 = vmul.f32 1.442695, %v195_v50  ;;  %v310_v31 = vand.u32 2147483647, %v745_v19 }
  0x38   :  { %v145_v59 = vmul.f32 %v645_v46, %v1029_v14  ;;  %v130_v62 = vmax.f32 %v1038_v48, 0.0  ;;  %v146_v8 = vmul.f32 %v648_v20, %v1038_v48  ;;  %v160_v10 = vsub.f32 %v128_v42, %v144_v43  ;;  %v696_v42 = vld [vmem:[%s1198_s0 + $0x38] sm:$0xff]  }
  0x39   :  { %750 = vlog2.f32 %v304_v44  ;;  %v308_v56 = vadd.f32 1.0, %v307_v45  ;;  %v677_v47 = vunpack.c.h.bf16 %v1047_v26  ;;  %v196_v32 = vsub.f32 0.0, %v180_v58  ;;  %v1153_v26 = vld [vmem:[%s1200_s2 + $0x30] sm:$0xff]  }
  0x3a   :  { %v747_v55 = vpop.eup %746  ;;  %752 = vpow2.f32 %v220_v49  ;;  %v1087_v13 = vunpack.c.h.bf16 %v695_v9  ;;  %vm1089_vm9 = vcmp.lt.f32.partialorder %v310_v31, 0.0004427343  ;;  %v161_v18 = vsub.f32 %v129_v53, %v145_v59 }
  0x3b   :  { %v749_v0 = vpop.eup %748  ;;  %v297_v12 = vmul.f32 0.6931472, %v747_v55  ;;  %754 = vpow2.f32 %v222_v57  ;;  %v309_v11 = vmul.f32 %v745_v19, %v308_v56  ;;  %v224_v22 = vmul.f32 1.442695, %v196_v32 }
  0x3c   :  { %v313_v63 = vadd.f32 1.0, %v749_v0  ;;  %v316_v7 = vmul.f32 -0.5, %v749_v0  ;;  %v319_v60 = vand.u32 2147483647, %v749_v0  ;;  %v162_v25 = vsub.f32 %v130_v62, %v146_v8 }
  0x3d   :  { %v303_v15 = vsel %vm1075_vm8, %v300_v51, %v297_v12  ;;  %v649_v28 = vunpack.c.h.bf16 %v1061_v40  ;;  %v131_v35 = vmax.f32 %v1051_v16, 0.0  ;;  %v181_v36 = vand.u32 2147483647, %v1087_v13 }
  0x3e   :  { %507 = vadd.xlane.f32.xlu0 %v506_v1  ;;  %v383_v33 = vadd.f32 %v303_v15, %v159_v38  ;;  %756 = vlog2.f32 %v313_v63  ;;  %v317_v21 = vadd.f32 1.0, %v316_v7  ;;  %v652_v38 = vunpack.c.l.bf16 %v1096_v5 }
  0x3f   :  { %v751_v14 = vpop.eup %750  ;;  %758 = vpow2.f32 %v224_v22  ;;  %vm1105_vm10 = vcmp.lt.f32.partialorder %v319_v60, 0.0004427343  ;;  %v197_v45 = vsub.f32 0.0, %v181_v36  ;;  %v147_v46 = vmul.f32 %v649_v28, %v1051_v16 }
  0x40   :  { %v753_v54 = vpop.eup %752  ;;  %v399_v23 = vmul.f32 %v673_v37, %v383_v33  ;;  %v306_v48 = vmul.f32 0.6931472, %v751_v14  ;;  %v318_v37 = vmul.f32 %v749_v0, %v317_v21  ;;  %v1118_v53 = vunpack.c.l.bf16 %v696_v42 }
  0x41   :  { %v322_v24 = vadd.f32 1.0, %v753_v54  ;;  %v325_v27 = vmul.f32 -0.5, %v753_v54  ;;  %v755_v29 = vpop.eup %754  ;;  %v328_v44 = vand.u32 2147483647, %v753_v54  ;;  %v226_v52 = vmul.f32 1.442695, %v197_v45 }
  0x42   :  { %v437_v34 = vsel %vm415_vm0, %v399_v23, 0.0  ;;  %v312_v30 = vsel %vm1089_vm9, %v309_v11, %v306_v48  ;;  %v331_v41 = vadd.f32 1.0, %v755_v29  ;;  %v334_v19 = vmul.f32 -0.5, %v755_v29 }
  0x43   :  { %438 = vadd.xlane.f32.xlu2 %v437_v34  ;;  %v384_v9 = vadd.f32 %v312_v30, %v160_v10  ;;  %760 = vlog2.f32 %v322_v24  ;;  %v326_v40 = vadd.f32 1.0, %v325_v27  ;;  %v337_v1 = vand.u32 2147483647, %v755_v29 }
  0x44   :  { %v757_v61 = vpop.eup %756  ;;  %762 = vlog2.f32 %v331_v41  ;;  %v335_v49 = vadd.f32 1.0, %v334_v19  ;;  %vm1125_vm11 = vcmp.lt.f32.partialorder %v328_v44, 0.0004427343  ;;  %v132_v12 = vmax.f32 %v1066_v2, 0.0 }
  0x45   :  { %v400_v43 = vmul.f32 %v676_v3, %v384_v9  ;;  %v315_v6 = vmul.f32 0.6931472, %v757_v61  ;;  %v759_v20 = vpop.eup %758  ;;  %v1123_v3 = vld [vmem:[%s1200_s2 + $0x28] sm:$0xff]   ;;  %v327_v16 = vmul.f32 %v753_v54, %v326_v40  ;;  %v148_v31 = vmul.f32 %v652_v38, %v1066_v2 }
  0x46   :  { %v340_v56 = vadd.f32 1.0, %v759_v20  ;;  %v343_v57 = vmul.f32 -0.5, %v759_v20  ;;  %764 = vpow2.f32 %v226_v52  ;;  %v680_v7 = vunpack.c.l.bf16 %v1123_v3 }
  0x47   :  { %v440_v50 = vsel %vm415_vm0, %v400_v43, 0.0  ;;  %v321_v51 = vsel %vm1105_vm10, %v318_v37, %v315_v6  ;;  %v163_v8 = vsub.f32 %v131_v35, %v147_v46  ;;  %v336_v15 = vmul.f32 %v755_v29, %v335_v49  ;;  %v703_v43 = vld [vmem:[%s1199_s1 + $0x38] sm:$0xff]  }
  0x48   :  { %441 = vadd.xlane.f32.xlu1 %v440_v50  ;;  %v385_v55 = vadd.f32 %v321_v51, %v161_v18  ;;  %766 = vlog2.f32 %v340_v56  ;;  %v344_v63 = vadd.f32 1.0, %v343_v57  ;;  %v182_v10 = vand.u32 2147483647, %v1118_v53 }
  0x49   :  { %v761_v58 = vpop.eup %760  ;;  %vm1139_vm12 = vcmp.lt.f32.partialorder %v337_v1, 0.0004427343  ;;  %v346_v14 = vand.u32 2147483647, %v759_v20  ;;  %v681_v22 = vunpack.c.h.bf16 %v1123_v3  ;;  %v164_v54 = vsub.f32 %v132_v12, %v148_v31 }
  0x4a   :  { %v401_v59 = vmul.f32 %v677_v47, %v385_v55  ;;  %v324_v62 = vmul.f32 0.6931472, %v761_v58  ;;  %v763_v32 = vpop.eup %762  ;;  %v198_v21 = vsub.f32 0.0, %v182_v10  ;;  %v345_v23 = vmul.f32 %v759_v20, %v344_v63 }
  0x4b   :  { %510 = vadd.xlane.f32.xlu2 %v1072_v4  ;;  %v512_v4 = vsel %vm415_vm0, %v677_v47, 0.0  ;;  %v333_v18 = vmul.f32 0.6931472, %v763_v32  ;;  %v653_v48 = vunpack.c.h.bf16 %v1096_v5  ;;  %vm347_vm13 = vcmp.lt.f32.partialorder %v346_v14, 0.0004427343 }
  0x4c   :  { %v443_v33 = vsel %vm415_vm0, %v401_v59, 0.0  ;;  %v330_v2 = vsel %vm1125_vm11, %v327_v16, %v324_v62  ;;  %v765_v60 = vpop.eup %764  ;;  %v228_v47 = vmul.f32 1.442695, %v198_v21  ;;  %v515_v9 = vsel %vm415_vm0, %v680_v7, 0.0 }
  0x4d   :  { %444 = vadd.xlane.f32.xlu0 %v443_v33  ;;  %v386_v17 = vadd.f32 %v330_v2, %v162_v25  ;;  %v339_v27 = vsel %vm1139_vm12, %v336_v15, %v333_v18  ;;  %v1155_v25 = vunpack.c.h.bf16 %v696_v42  ;;  %v349_v34 = vadd.f32 1.0, %v765_v60 }
  0x4e   :  { %v767_v28 = vpop.eup %766  ;;  %v387_v29 = vadd.f32 %v339_v27, %v163_v8  ;;  %v352_v30 = vmul.f32 -0.5, %v765_v60  ;;  %768 = vpow2.f32 %v228_v47  ;;  %v684_v37 = vunpack.c.l.bf16 %v1153_v26  ;;  %v710_v8 = vld [vmem:[%s1200_s2 + $0x38] sm:$0xff]   ;;  %s830_s2 = smov [#allocation2]  }
  0x4f   :  { %v402_v24 = vmul.f32 %v680_v7, %v386_v17  ;;  %v342_v35 = vmul.f32 0.6931472, %v767_v28  ;;  %770 = vlog2.f32 %v349_v34  ;;  %v183_v39 = vand.u32 2147483647, %v1155_v25  ;;  %s567_s9 = sshll.u32 %s830_s2, 4  ;;  %s568_s9 = int_to_ptr.vmem [resolvable:$true] %s567_s9 }
  0x50   :  { %513 = vadd.xlane.f32.xlu1 %v512_v4  ;;  %v403_v36 = vmul.f32 %v681_v22, %v387_v29  ;;  %v353_v61 = vadd.f32 1.0, %v352_v30  ;;  %v133_v41 = vmax.f32 %v1087_v13, 0.0  ;;  %v149_v19 = vmul.f32 %v653_v48, %v1087_v13 }
  0x51   :  { %v446_v5 = vsel %vm415_vm0, %v402_v24, 0.0  ;;  %v348_v38 = vsel %vm347_vm13, %v345_v23, %v342_v35  ;;  %v355_v42 = vand.u32 2147483647, %v765_v60  ;;  %v199_v44 = vsub.f32 0.0, %v183_v39 }
  0x52   :  { %v388_v40 = vadd.f32 %v348_v38, %v164_v54  ;;  %v449_v6 = vsel %vm415_vm0, %v403_v36, 0.0  ;;  %v518_v49 = vsel %vm415_vm0, %v681_v22, 0.0  ;;  %v354_v1 = vmul.f32 %v765_v60, %v353_v61 }
  0x53   :  { %447 = vadd.xlane.f32.xlu2 %v446_v5  ;;  %v656_v20 = vunpack.c.l.bf16 %v703_v43  ;;  %v230_v50 = vmul.f32 1.442695, %v199_v44  ;;  %v165_v52 = vsub.f32 %v133_v41, %v149_v19  ;;  %vm356_vm14 = vcmp.lt.f32.partialorder %v355_v42, 0.0004427343 }
  0x54   :  { %v404_v45 = vmul.f32 %v684_v37, %v388_v40  ;;  %v769_v46 = vpop.eup %768  ;;  %v685_v56 = vunpack.c.h.bf16 %v1153_v26  ;;  %v134_v58 = vmax.f32 %v1118_v53, 0.0  ;;  %v521_v62 = vsel %vm415_vm0, %v684_v37, 0.0 }
  0x55   :  { %516 = vadd.xlane.f32.xlu0 %v515_v9  ;;  %v771_v51 = vpop.eup %770  ;;  %v358_v13 = vadd.f32 1.0, %v769_v46  ;;  %v361_v55 = vmul.f32 -0.5, %v769_v46  ;;  %772 = vpow2.f32 %v230_v50  ;;  %v150_v0 = vmul.f32 %v656_v20, %v1118_v53 }
  0x56   :  { %v351_v3 = vmul.f32 0.6931472, %v771_v51  ;;  %v452_v16 = vsel %vm415_vm0, %v404_v45, 0.0  ;;  %v364_v59 = vand.u32 2147483647, %v769_v46  ;;  %v657_v32 = vunpack.c.h.bf16 %v703_v43 }
  0x57   :  { %774 = vlog2.f32 %v358_v13  ;;  %v362_v12 = vadd.f32 1.0, %v361_v55  ;;  %v166_v15 = vsub.f32 %v134_v58, %v150_v0  ;;  %v688_v4 = vunpack.c.l.bf16 %v710_v8 }
  0x58   :  { %450 = vadd.xlane.f32.xlu1 %v449_v6  ;;  %v357_v57 = vsel %vm356_vm14, %v354_v1, %v351_v3  ;;  %vm365_vm15 = vcmp.lt.f32.partialorder %v364_v59, 0.0004427343  ;;  %v524_v17 = vsel %vm415_vm0, %v685_v56, 0.0  ;;  %v135_v54 = vmax.f32 %v1155_v25, 0.0 }
  0x59   :  { %v389_v31 = vadd.f32 %v357_v57, %v165_v52  ;;  %v363_v10 = vmul.f32 %v769_v46, %v362_v12  ;;  %v151_v23 = vmul.f32 %v657_v32, %v1155_v25  ;;  %v527_v47 = vsel %vm415_vm0, %v688_v4, 0.0 }
  0x5a   :  { %v689_v34 = vunpack.c.h.bf16 %v710_v8 }
  0x5b   :  { %519 = vadd.xlane.f32.xlu2 %v518_v49  ;;  %v405_v63 = vmul.f32 %v685_v56, %v389_v31  ;;  %v773_v7 = vpop.eup %772  ;;  %v167_v28 = vsub.f32 %v135_v54, %v151_v23 }
  0x5c   :  { %v367_v53 = vadd.f32 1.0, %v773_v7  ;;  %v370_v11 = vmul.f32 -0.5, %v773_v7  ;;  %v373_v48 = vand.u32 2147483647, %v773_v7  ;;  %v530_v35 = vsel %vm415_vm0, %v689_v34, 0.0 }
  0x5d   :  { %453 = vadd.xlane.f32.xlu0 %v452_v16  ;;  %v775_v33 = vpop.eup %774  ;;  %v455_v2 = vsel %vm415_vm0, %v405_v63, 0.0 }
  0x5e   :  { %v360_v14 = vmul.f32 0.6931472, %v775_v33  ;;  %776 = vlog2.f32 %v367_v53  ;;  %v371_v21 = vadd.f32 1.0, %v370_v11  ;;  %vm374_vm1 = vcmp.lt.f32.partialorder %v373_v48, 0.0004427343 }
  0x60   :  { %522 = vadd.xlane.f32.xlu1 %v521_v62  ;;  %v366_v18 = vsel %vm365_vm15, %v363_v10, %v360_v14  ;;  %v372_v24 = vmul.f32 %v773_v7, %v371_v21 }
  0x61   :  { %v390_v22 = vadd.f32 %v366_v18, %v166_v15 }
  0x63   :  { %456 = vadd.xlane.f32.xlu2 %v455_v2  ;;  %v406_v60 = vmul.f32 %v688_v4, %v390_v22 }
  0x64   :  { %v777_v27 = vpop.eup %776 }
  0x65   :  { %525 = vadd.xlane.f32.xlu0 %v524_v17  ;;  %v458_v26 = vsel %vm415_vm0, %v406_v60, 0.0  ;;  %v369_v29 = vmul.f32 0.6931472, %v777_v27 }
  0x67   :  { %v375_v30 = vsel %vm374_vm1, %v372_v24, %v369_v29 }
  0x68   :  { %459 = vadd.xlane.f32.xlu1 %v458_v26  ;;  %v391_v5 = vadd.f32 %v375_v30, %v167_v28 }
  0x6a   :  { %v407_v25 = vmul.f32 %v689_v34, %v391_v5 }
  0x6b   :  { %528 = vadd.xlane.f32.xlu2 %v527_v47 }
  0x6c   :  { %v461_v36 = vsel %vm415_vm0, %v407_v25, 0.0  ;;  %v408_v25 = vlaneseq }
  0x6d   :  { %462 = vadd.xlane.f32.xlu0 %v461_v36 }
  0x70   :  { %531 = vadd.xlane.f32.xlu1 %v530_v35 }
  0x78   :  { %v493_v9 = vpop.xlane.xlu0 %492  ;;  %v487_v38 = vpop.xlane.xlu2 %486 }
  0x79   :  { %v496_v37 = vpop.xlane.xlu1 %495 }
  0x80   :  { %v499_v61 = vpop.xlane.xlu0 %498  ;;  %v490_v41 = vpop.xlane.xlu2 %489 }
  0x81   :  { %v505_v39 = vpop.xlane.xlu1 %504  ;;  %v533_v20 = vadd.f32 %v490_v41, %v487_v38 }
  0x83   :  { %v534_v52 = vadd.f32 %v533_v20, %v493_v9 }
  0x85   :  { %v535_v16 = vadd.f32 %v534_v52, %v496_v37 }
  0x87   :  { %v536_v58 = vadd.f32 %v535_v16, %v499_v61  ;;  %v409_v61 = vshrl.u32 %v408_v25, 7 }
  0x88   :  { %v502_v43 = vpop.xlane.xlu2 %501 }
  0x89   :  { %v537_v59 = vadd.f32 %v536_v58, %v502_v43  ;;  %vm410_vm0 = vcmp.eq.s32.totalorder %v409_v61, 0 }
  0x8b   :  { %v538_v7 = vadd.f32 %v537_v59, %v505_v39  ;;  %v412_v39 = vand.u32 127, %v408_v25 }
  0x8d   :  { %vm413_vm2 = vcmp.eq.s32.totalorder %v412_v39, 0 }
  0x8e   :  { %vm1184_vm3 = vmand %vm410_vm0, %vm413_vm2 }
  0x97   :  { %v424_v19 = vpop.xlane.xlu1 %423 }
  0x99   :  { %v418_v40 = vpop.xlane.xlu0 %417 }
  0x9f   :  { %v427_v6 = vpop.xlane.xlu1 %426  ;;  %v430_v44 = vpop.xlane.xlu2 %429 }
  0xa1   :  { %v421_v42 = vpop.xlane.xlu0 %420 }
  0xa2   :  { %v464_v50 = vadd.f32 %v421_v42, %v418_v40 }
  0xa4   :  { %v465_v13 = vadd.f32 %v464_v50, %v424_v19 }
  0xa6   :  { %v466_v56 = vadd.f32 %v465_v13, %v427_v6 }
  0xa7   :  { %v433_v46 = vpop.xlane.xlu1 %432 }
  0xa8   :  { %v467_v0 = vadd.f32 %v466_v56, %v430_v44 }
  0xa9   :  { %v436_v45 = vpop.xlane.xlu0 %435 }
  0xaa   :  { %v468_v62 = vadd.f32 %v467_v0, %v433_v46 }
  0xac   :  { %v469_v8 = vadd.f32 %v468_v62, %v436_v45 }
  0xb1   :  { %v508_v1 = vpop.xlane.xlu0 %507 }
  0xb2   :  { %v539_v10 = vadd.f32 %v538_v7, %v508_v1 }
  0xb6   :  { %v439_v49 = vpop.xlane.xlu2 %438 }
  0xb7   :  { %v470_v33 = vadd.f32 %v469_v8, %v439_v49 }
  0xbb   :  { %v442_v51 = vpop.xlane.xlu1 %441 }
  0xbc   :  { %v471_v2 = vadd.f32 %v470_v33, %v442_v51 }
  0xbe   :  { %v511_v55 = vpop.xlane.xlu2 %510 }
  0xbf   :  { %v540_v53 = vadd.f32 %v539_v10, %v511_v55 }
  0xc0   :  { %v445_v3 = vpop.xlane.xlu0 %444 }
  0xc1   :  { %v472_v4 = vadd.f32 %v471_v2, %v445_v3 }
  0xc3   :  { %v514_v57 = vpop.xlane.xlu1 %513 }
  0xc4   :  { %v541_v14 = vadd.f32 %v540_v53, %v514_v57 }
  0xc6   :  { %v448_v12 = vpop.xlane.xlu2 %447 }
  0xc7   :  { %v473_v21 = vadd.f32 %v472_v4, %v448_v12 }
  0xc8   :  { %v517_v31 = vpop.xlane.xlu0 %516 }
  0xc9   :  { %v542_v18 = vadd.f32 %v541_v14, %v517_v31 }
  0xcb   :  { %v451_v63 = vpop.xlane.xlu1 %450 }
  0xcc   :  { %v474_v54 = vadd.f32 %v473_v21, %v451_v63 }
  0xce   :  { %v520_v15 = vpop.xlane.xlu2 %519 }
  0xcf   :  { %v543_v23 = vadd.f32 %v542_v18, %v520_v15 }
  0xd0   :  { %v454_v32 = vpop.xlane.xlu0 %453 }
  0xd1   :  { %v475_v24 = vadd.f32 %v474_v54, %v454_v32 }
  0xd3   :  { %v523_v11 = vpop.xlane.xlu1 %522 }
  0xd4   :  { %v544_v60 = vadd.f32 %v543_v23, %v523_v11 }
  0xd6   :  { %v457_v17 = vpop.xlane.xlu2 %456 }
  0xd7   :  { %v476_v47 = vadd.f32 %v475_v24, %v457_v17 }
  0xd8   :  { %v526_v22 = vpop.xlane.xlu0 %525 }
  0xd9   :  { %v545_v27 = vadd.f32 %v544_v60, %v526_v22 }
  0xdb   :  { %v460_v48 = vpop.xlane.xlu1 %459 }
  0xdc   :  { %v477_v28 = vadd.f32 %v476_v47, %v460_v48 }
  0xde   :  { %v529_v26 = vpop.xlane.xlu2 %528 }
  0xdf   :  { %v546_v29 = vadd.f32 %v545_v27, %v529_v26 }
  0xe0   :  { %v463_v30 = vpop.xlane.xlu0 %462 }
  0xe1   :  { %v478_v35 = vadd.f32 %v477_v28, %v463_v30 }
  0xe3   :  { %v532_v34 = vpop.xlane.xlu1 %531  ;;  %v479_v9 = vrot.slane %v478_v35, 4 }
  0xe4   :  { %v547_v5 = vadd.f32 %v546_v29, %v532_v34 }
  0xe5   :  { %v480_v38 = vadd.f32 %v479_v9, %v478_v35 }
  0xe6   :  { %v548_v36 = vrot.slane %v547_v5, 4 }
  0xe7   :  { %v481_v41 = vrot.slane %v480_v38, 2 }
  0xe8   :  { %v549_v37 = vadd.f32 %v548_v36, %v547_v5 }
  0xe9   :  { %v482_v42 = vadd.f32 %v481_v41, %v480_v38 }
  0xea   :  { %v550_v40 = vrot.slane %v549_v37, 2 }
  0xeb   :  { %v483_v6 = vrot.slane %v482_v42, 1 }
  0xec   :  { %v551_v19 = vadd.f32 %v550_v40, %v549_v37 }
  0xed   :  { %v484_v46 = vadd.f32 %v483_v6, %v482_v42 }
  0xee   :  { %v552_v43 = vrot.slane %v551_v19, 1 }
  0xef   :  { %v555_v49 = vsel %vm1184_vm3, %v484_v46, 0.0 }
  0xf0   :  { %v553_v45 = vadd.f32 %v552_v43, %v551_v19  ;;  %557 = vst [vmem:[#allocation2] sm:$0xff] %v555_v49 }
  0xf1   :  { %572 = dma.vmem_to_hbm [thread:$0]  %s568_s9, 128, %s570_s12, [#allocation3]  }
  0xf2   :  { %v559_v1 = vsel %vm1184_vm3, %v553_v45, 0.0 }
  0xf3   :  { %561 = vst [vmem:[#allocation4] sm:$0xff] %v559_v1 }
  0xf4   :  { %583 = dma.vmem_to_hbm [thread:$0]  %s579_s14, 128, %s581_s17, [#allocation5]  }
  0xf5   :  { %826 = dma.done.wait [#allocation3], 128  }
  0xf6   :  { %827 = vsyncadd [#allocation3], 4294967168 }
  0xf7   :  { %828 = dma.done.wait [#allocation5], 128  }
  0xf8   :  { %829 = vsyncadd [#allocation5], 4294967168 }
  0xf9   :  { %592 = vsyncpa [#allocation3], 1 }
  0xfa   :  { %593 = vsyncpa [#allocation5], 1 }

</bundles_post_ra>
